<compile_context>
chip_gen: v5e
topology: v5e:2x2
jax: 0.10.0
libtpu: 0.0.40
codegen_flags: <defaults>
</compile_context>

<pallas_src>
import functools

import jax
import jax.numpy as jnp
from jax.experimental import pallas as pl
from jax.experimental.pallas import tpu as pltpu

IN_FEATURES = 28
OUT_FEATURES = 2
BN_EPS = 1e-5


def _round_up(x, m):
    return ((x + m - 1) // m) * m


# ---------------------------------------------------------------------------
# Single-pass kernel (whole batch in one tile, grid=()).  h stays resident, so
# BatchNorm uses centered variance for free and x is read from HBM only once.
# ---------------------------------------------------------------------------
def single_tile_kernel(x_ref, w1t_ref, b1_ref, gamma_ref, beta_ref,
                       w2t_ref, b2_ref, o_ref, *, true_b):
    h = jnp.dot(x_ref[...], w1t_ref[...],
                preferred_element_type=jnp.float32) + b1_ref[...]        # (B, 28)
    inv_b = 1.0 / float(true_b)
    mean = jnp.sum(h, axis=0, keepdims=True) * inv_b                     # (1, 28)
    hc = h - mean
    var = jnp.sum(hc * hc, axis=0, keepdims=True) * inv_b                # biased
    scale = gamma_ref[...] * jax.lax.rsqrt(var + BN_EPS)
    hn = jnp.maximum(hc * scale + beta_ref[...], 0.0)                    # BN+ReLU
    logits = jnp.dot(hn, w2t_ref[...],
                     preferred_element_type=jnp.float32) + b2_ref[...]   # (B, 2)
    o_ref[...] = pl.reciprocal(1.0 + jnp.exp(-logits),
                               approx=False).astype(o_ref.dtype)


# ---------------------------------------------------------------------------
# Two-call path for large batches.
# Call A: per-feature sum / sum-of-squares of h = x @ w1^T + b1 over the batch,
#         accumulated in the resident (1, 28) output blocks ("arbitrary" axis).
# ---------------------------------------------------------------------------
def stats_kernel(x_ref, w1t_ref, b1_ref, sum_ref, ssq_ref, *, true_b, needs_mask):
    i = pl.program_id(0)

    @pl.when(i == 0)
    def _init():
        sum_ref[...] = jnp.zeros_like(sum_ref)
        ssq_ref[...] = jnp.zeros_like(ssq_ref)

    h = jnp.dot(x_ref[...], w1t_ref[...],
                preferred_element_type=jnp.float32) + b1_ref[...]        # (tb, 28)
    if needs_mask:
        tb = x_ref.shape[0]
        rows = i * tb + jax.lax.broadcasted_iota(jnp.int32, h.shape, 0)
        h = jnp.where(rows < true_b, h, 0.0)
    sum_ref[...] += jnp.sum(h, axis=0, keepdims=True)
    ssq_ref[...] += jnp.sum(h * h, axis=0, keepdims=True)


# ---------------------------------------------------------------------------
# Call B: Linear1 -> folded BN scale/shift (Linear1 bias already folded in) ->
#         ReLU -> Linear2 -> sigmoid, batch-tiled and megacore-parallel.
# ---------------------------------------------------------------------------
def compute_kernel(x_ref, w1t_ref, scale_ref, shift_ref, w2t_ref, b2_ref, o_ref):
    h = jnp.dot(x_ref[...], w1t_ref[...], preferred_element_type=jnp.float32)
    hn = jnp.maximum(h * scale_ref[...] + shift_ref[...], 0.0)
    logits = jnp.dot(hn, w2t_ref[...],
                     preferred_element_type=jnp.float32) + b2_ref[...]   # (tb, 2)
    o_ref[...] = pl.reciprocal(1.0 + jnp.exp(-logits),
                               approx=False).astype(o_ref.dtype)


def network_forward(x, params, *, tb_max=4096):
    """x: (B, 28) float32. Returns (B, 2) float32.

    tb_max=4096 is safe under the v5e 16 MiB default scoped-VMEM limit; raise
    it (and vmem_limit_bytes) only with per-generation VMEM budgeting in mind
    (v7x: 64 MiB physical / 32 MiB scoped default).
    """
    B, f_in = x.shape
    assert f_in == IN_FEATURES
    x = jnp.asarray(x, jnp.float32)

    # Layout plumbing once in the wrapper: pre-transposed weights, (1, F) rows.
    w1t = jnp.asarray(params["w1"], jnp.float32).T                       # (28, 28)
    b1 = jnp.asarray(params["b1"], jnp.float32).reshape(1, IN_FEATURES)
    w2t = jnp.asarray(params["w2"], jnp.float32).T                       # (28, 2)
    b2 = jnp.asarray(params["b2"], jnp.float32).reshape(1, OUT_FEATURES)
    gamma = jnp.asarray(params["gamma"], jnp.float32).reshape(1, IN_FEATURES)
    beta = jnp.asarray(params["beta"], jnp.float32).reshape(1, IN_FEATURES)

    # ---------------- single-tile fast path ----------------
    if B <= tb_max:
        return pl.pallas_call(
            functools.partial(single_tile_kernel, true_b=B),
            out_shape=jax.ShapeDtypeStruct((B, OUT_FEATURES), jnp.float32),
            in_specs=[
                pl.BlockSpec((B, IN_FEATURES), lambda: (0, 0)),           # x
                pl.BlockSpec((IN_FEATURES, IN_FEATURES), lambda: (0, 0)), # w1t
                pl.BlockSpec((1, IN_FEATURES), lambda: (0, 0)),           # b1
                pl.BlockSpec((1, IN_FEATURES), lambda: (0, 0)),           # gamma
                pl.BlockSpec((1, IN_FEATURES), lambda: (0, 0)),           # beta
                pl.BlockSpec((IN_FEATURES, OUT_FEATURES), lambda: (0, 0)),# w2t
                pl.BlockSpec((1, OUT_FEATURES), lambda: (0, 0)),          # b2
            ],
            out_specs=pl.BlockSpec((B, OUT_FEATURES), lambda: (0, 0)),
        )(x, w1t, b1, gamma, beta, w2t, b2)

    # ---------------- two-call tiled path ----------------
    tb = _round_up(min(tb_max, _round_up(B, 8)), 8)
    b_pad = _round_up(B, tb)
    needs_mask = (b_pad != B)
    xp = jnp.pad(x, ((0, b_pad - B), (0, 0))) if needs_mask else x
    nb = b_pad // tb

    # Call A: whole-batch per-feature sum / sum-of-squares of h.
    sums, ssq = pl.pallas_call(
        functools.partial(stats_kernel, true_b=B, needs_mask=needs_mask),
        out_shape=(jax.ShapeDtypeStruct((1, IN_FEATURES), jnp.float32),
                   jax.ShapeDtypeStruct((1, IN_FEATURES), jnp.float32)),
        grid=(nb,),
        in_specs=[
            pl.BlockSpec((tb, IN_FEATURES), lambda i: (i, 0)),            # x tile
            pl.BlockSpec((IN_FEATURES, IN_FEATURES), lambda i: (0, 0)),   # w1t
            pl.BlockSpec((1, IN_FEATURES), lambda i: (0, 0)),             # b1
        ],
        out_specs=(pl.BlockSpec((1, IN_FEATURES), lambda i: (0, 0)),
                   pl.BlockSpec((1, IN_FEATURES), lambda i: (0, 0))),
        compiler_params=pltpu.CompilerParams(
            dimension_semantics=("arbitrary",)),
    )(xp, w1t, b1)

    # Fold BatchNorm (and the Linear1 bias) into one per-feature scale/shift.
    # Tiny (1, 28) XLA ops: rsqrt/divide happen once per forward, not per tile.
    # TODO(synk): one-pass E[h^2]-E[h]^2 can cancel if |mean| >> std; fine for
    # standardized tabular inputs.
    inv_b = 1.0 / float(B)
    mean = sums * inv_b
    var = ssq * inv_b - mean * mean                         # biased (training BN)
    scale = gamma * jax.lax.rsqrt(var + BN_EPS)             # (1, 28)
    shift = (b1 - mean) * scale + beta                      # (1, 28)

    # Call B: batch-tiled compute pass (megacore-parallel on v7x).
    out = pl.pallas_call(
        compute_kernel,
        out_shape=jax.ShapeDtypeStruct((b_pad, OUT_FEATURES), jnp.float32),
        grid=(nb,),
        in_specs=[
            pl.BlockSpec((tb, IN_FEATURES), lambda i: (i, 0)),            # x tile
            pl.BlockSpec((IN_FEATURES, IN_FEATURES), lambda i: (0, 0)),   # w1t
            pl.BlockSpec((1, IN_FEATURES), lambda i: (0, 0)),             # scale
            pl.BlockSpec((1, IN_FEATURES), lambda i: (0, 0)),             # shift
            pl.BlockSpec((IN_FEATURES, OUT_FEATURES), lambda i: (0, 0)),  # w2t
            pl.BlockSpec((1, OUT_FEATURES), lambda i: (0, 0)),            # b2
        ],
        out_specs=pl.BlockSpec((tb, OUT_FEATURES), lambda i: (i, 0)),
        compiler_params=pltpu.CompilerParams(
            dimension_semantics=("parallel",)),
    )(xp, w1t, scale, shift, w2t, b2)

    return out[:B]


def init_params(key):
    """Deterministic parameter init matching nn.Linear / BatchNorm1d shapes."""
    k1, k2, k3, k4 = jax.random.split(key, 4)
    bound = 1.0 / jnp.sqrt(float(IN_FEATURES))
    w1 = jax.random.uniform(k1, (IN_FEATURES, IN_FEATURES), jnp.float32, -bound, bound)
    b1 = jax.random.uniform(k2, (1, IN_FEATURES), jnp.float32, -bound, bound)
    w2 = jax.random.uniform(k3, (OUT_FEATURES, IN_FEATURES), jnp.float32, -bound, bound)
    b2 = jax.random.uniform(k4, (1, OUT_FEATURES), jnp.float32, -bound, bound)
    gamma = jnp.ones((1, IN_FEATURES), jnp.float32)   # BatchNorm weight
    beta = jnp.zeros((1, IN_FEATURES), jnp.float32)   # BatchNorm bias
    return {"w1": w1, "b1": b1, "w2": w2, "b2": b2, "gamma": gamma, "beta": beta}


def _reference(x, params):
    h = x @ params["w1"].T + params["b1"]
    mean = jnp.mean(h, axis=0, keepdims=True)
    var = jnp.mean((h - mean) ** 2, axis=0, keepdims=True)
    h = (h - mean) / jnp.sqrt(var + BN_EPS) * params["gamma"] + params["beta"]
    h = jnp.maximum(h, 0.0)
    return jax.nn.sigmoid(h @ params["w2"].T + params["b2"])


if __name__ == "__main__":
    key = jax.random.PRNGKey(0)
    pkey, xkey = jax.random.split(key)
    params = init_params(pkey)

    # Case 1: small batch -> single-pass fast path (grid=()).
    x = jax.random.normal(xkey, (8, IN_FEATURES), jnp.float32)
    out = jax.block_until_ready(network_forward(x, params))
    assert out.shape == (8, OUT_FEATURES)
    assert bool(jnp.all((out > 0.0) & (out < 1.0)))
    ref = _reference(x, params)
    assert bool(jnp.allclose(out, ref, atol=2e-5, rtol=2e-5)), "mismatch (single tile)"

    # Case 2: two-call path with padded last tile (B=20, tb=8 -> 3 tiles, mask).
    x2 = jax.random.normal(jax.random.PRNGKey(1), (20, IN_FEATURES), jnp.float32)
    out2 = jax.block_until_ready(network_forward(x2, params, tb_max=8))
    assert out2.shape == (20, OUT_FEATURES)
    ref2 = _reference(x2, params)
    assert bool(jnp.allclose(out2, ref2, atol=2e-5, rtol=2e-5)), "mismatch (tiled/padded)"

    # Case 3: two-call path, exactly divisible batch (no masking branch).
    x3 = jax.random.normal(jax.random.PRNGKey(2), (32, IN_FEATURES), jnp.float32)
    out3 = jax.block_until_ready(network_forward(x3, params, tb_max=16))
    assert out3.shape == (32, OUT_FEATURES)
    ref3 = _reference(x3, params)
    assert bool(jnp.allclose(out3, ref3, atol=2e-5, rtol=2e-5)), "mismatch (tiled/exact)"

    print("KERNEL_OK")
</pallas_src>

<mosaic_0001>
module attributes {stable_mosaic.version = 11 : i64} {
  func.func @single_tile_kernel(%arg0: memref<8x28xf32, #tpu.memory_space<vmem>>, %arg1: memref<28x28xf32, #tpu.memory_space<vmem>>, %arg2: memref<1x28xf32, #tpu.memory_space<vmem>>, %arg3: memref<1x28xf32, #tpu.memory_space<vmem>>, %arg4: memref<1x28xf32, #tpu.memory_space<vmem>>, %arg5: memref<28x2xf32, #tpu.memory_space<vmem>>, %arg6: memref<1x2xf32, #tpu.memory_space<vmem>>, %arg7: memref<8x2xf32, #tpu.memory_space<vmem>>) attributes {dimension_semantics = [], scalar_prefetch = 0 : i64, scratch_operands = 0 : i64, tpu.core_type = #tpu.core_type<tc>} {
    %c0 = arith.constant 0 : index
    %c0_0 = arith.constant 0 : index
    %0 = vector.load %arg0[%c0, %c0_0] : memref<8x28xf32, #tpu.memory_space<vmem>>, vector<8x28xf32>
    %c0_1 = arith.constant 0 : index
    %c0_2 = arith.constant 0 : index
    %1 = vector.load %arg1[%c0_1, %c0_2] : memref<28x28xf32, #tpu.memory_space<vmem>>, vector<28x28xf32>
    %cst = arith.constant dense<0.000000e+00> : vector<8x28xf32>
    %2 = tpu.matmul %0, %1, %cst {dimension_numbers = #tpu.dot_dimension_numbers<[1], [0], [0], [1], [0, 0, 1, 1], [], []>} : vector<8x28xf32>, vector<28x28xf32>, vector<8x28xf32> -> vector<8x28xf32>
    %c0_3 = arith.constant 0 : index
    %c0_4 = arith.constant 0 : index
    %3 = vector.load %arg2[%c0_3, %c0_4] : memref<1x28xf32, #tpu.memory_space<vmem>>, vector<1x28xf32>
    %4 = vector.broadcast %3 : vector<1x28xf32> to vector<8x28xf32>
    %5 = arith.addf %2, %4 : vector<8x28xf32>
    %cst_5 = arith.constant dense<0.000000e+00> : vector<28xf32>
    %6 = vector.multi_reduction <add>, %5, %cst_5 [0] : vector<8x28xf32> to vector<28xf32>
    %7 = vector.shape_cast %6 : vector<28xf32> to vector<1x28xf32>
    %cst_6 = arith.constant 1.250000e-01 : f32
    %8 = vector.broadcast %cst_6 : f32 to vector<1x28xf32>
    %9 = arith.mulf %7, %8 : vector<1x28xf32>
    %10 = vector.broadcast %9 : vector<1x28xf32> to vector<8x28xf32>
    %11 = arith.subf %5, %10 : vector<8x28xf32>
    %12 = arith.mulf %11, %11 : vector<8x28xf32>
    %cst_7 = arith.constant dense<0.000000e+00> : vector<28xf32>
    %13 = vector.multi_reduction <add>, %12, %cst_7 [0] : vector<8x28xf32> to vector<28xf32>
    %14 = vector.shape_cast %13 : vector<28xf32> to vector<1x28xf32>
    %cst_8 = arith.constant 1.250000e-01 : f32
    %15 = vector.broadcast %cst_8 : f32 to vector<1x28xf32>
    %16 = arith.mulf %14, %15 : vector<1x28xf32>
    %c0_9 = arith.constant 0 : index
    %c0_10 = arith.constant 0 : index
    %17 = vector.load %arg3[%c0_9, %c0_10] : memref<1x28xf32, #tpu.memory_space<vmem>>, vector<1x28xf32>
    %cst_11 = arith.constant 9.99999974E-6 : f32
    %18 = vector.broadcast %cst_11 : f32 to vector<1x28xf32>
    %19 = arith.addf %16, %18 : vector<1x28xf32>
    %20 = math.rsqrt %19 : vector<1x28xf32>
    %21 = arith.mulf %17, %20 : vector<1x28xf32>
    %22 = vector.broadcast %21 : vector<1x28xf32> to vector<8x28xf32>
    %23 = arith.mulf %11, %22 : vector<8x28xf32>
    %c0_12 = arith.constant 0 : index
    %c0_13 = arith.constant 0 : index
    %24 = vector.load %arg4[%c0_12, %c0_13] : memref<1x28xf32, #tpu.memory_space<vmem>>, vector<1x28xf32>
    %25 = vector.broadcast %24 : vector<1x28xf32> to vector<8x28xf32>
    %26 = arith.addf %23, %25 : vector<8x28xf32>
    %cst_14 = arith.constant 0.000000e+00 : f32
    %27 = vector.broadcast %cst_14 : f32 to vector<8x28xf32>
    %28 = arith.maximumf %26, %27 : vector<8x28xf32>
    %c0_15 = arith.constant 0 : index
    %c0_16 = arith.constant 0 : index
    %29 = vector.load %arg5[%c0_15, %c0_16] : memref<28x2xf32, #tpu.memory_space<vmem>>, vector<28x2xf32>
    %cst_17 = arith.constant dense<0.000000e+00> : vector<8x2xf32>
    %30 = tpu.matmul %28, %29, %cst_17 {dimension_numbers = #tpu.dot_dimension_numbers<[1], [0], [0], [1], [0, 0, 1, 1], [], []>} : vector<8x28xf32>, vector<28x2xf32>, vector<8x2xf32> -> vector<8x2xf32>
    %c0_18 = arith.constant 0 : index
    %c0_19 = arith.constant 0 : index
    %31 = vector.load %arg6[%c0_18, %c0_19] : memref<1x2xf32, #tpu.memory_space<vmem>>, vector<1x2xf32>
    %32 = vector.broadcast %31 : vector<1x2xf32> to vector<8x2xf32>
    %33 = arith.addf %30, %32 : vector<8x2xf32>
    %cst_20 = arith.constant 0.000000e+00 : f32
    %34 = vector.broadcast %cst_20 : f32 to vector<8x2xf32>
    %35 = arith.subf %34, %33 : vector<8x2xf32>
    %36 = math.exp %35 : vector<8x2xf32>
    %cst_21 = arith.constant 1.000000e+00 : f32
    %37 = vector.broadcast %cst_21 : f32 to vector<8x2xf32>
    %38 = arith.addf %37, %36 : vector<8x2xf32>
    %39 = tpu.reciprocal %38 : vector<8x2xf32> -> vector<8x2xf32>
    %c0_22 = arith.constant 0 : index
    %c0_23 = arith.constant 0 : index
    %40 = vector.load %arg7[%c0_22, %c0_23] : memref<8x2xf32, #tpu.memory_space<vmem>>, vector<8x2xf32>
    tpu.vector_store %arg7[%c0_22, %c0_23], %39 {strides = array<i32>} : memref<8x2xf32, #tpu.memory_space<vmem>>, vector<8x2xf32>,
    return
  }
}

</mosaic_0001>

<bundles_post_ra>
// kernel: tpu_custom_call.1
= control target key start
LH: loop header
LB: loop body
LE: loop exit
PB: predicated region body
PF: predicated region fallthrough
CT: control target
= control target key end

     0   :  { %12 = vsyncpa [#allocation3], 0  ;;  %s217_s27 = smov [#allocation2]   ;;  %s306_s0 = inlined_call_operand.hbm [shape: f32[8,28], index: 0, kind: input, shape index: {}]   ;;  %s307_s1 = inlined_call_operand.vmem [shape: f32[28,28], index: 1, kind: input, shape index: {}]   ;;  %s308_s2 = inlined_call_operand.vmem [shape: f32[1,28], index: 2, kind: input, shape index: {}]   ;;  %s309_s3 = inlined_call_operand.vmem [shape: f32[1,28], index: 3, kind: input, shape index: {}]   ;;  %s310_s4 = inlined_call_operand.vmem [shape: f32[1,28], index: 4, kind: input, shape index: {}]   ;;  %s311_s5 = inlined_call_operand.vmem [shape: f32[28,2], index: 5, kind: input, shape index: {}]   ;;  %s312_s6 = inlined_call_operand.vmem [shape: f32[1,2], index: 6, kind: input, shape index: {}]   ;;  %s313_s7 = inlined_call_operand.vmem [shape: f32[8,2], index: 7, kind: output, shape index: {}]  }
   0x1   :  { %s18_s26 = sshll.u32 %s306_s0, 4  ;;  %s20_s28 = sshll.u32 %s217_s27, 4  ;;  %s19_s26 = int_to_ptr.hbm [resolvable:$true] %s18_s26  ;;  %s21_s28 = int_to_ptr.vmem [resolvable:$true] %s20_s28 }
   0x2   :  { %23 = dma.hbm_to_vmem [thread:$0]  %s19_s26, 128, %s21_s28, [#allocation3]  }
   0x3   :  { %215 = dma.done.wait [#allocation3], 128  }
   0x4   :  { %216 = vsyncadd [#allocation3], 4294967168  ;;  %vm53_vm0 = vcmask 1043456   ;;  %v44_v0 = vld [vmem:[%s307_s1 + $0x18] sm:$0xf]  ;;  %v43_v1 = vld [vmem:[%s307_s1 + $0x10] sm:$0xff] }
   0x5   :  { %177 = vmatpush.msk.msra.mxu0 %vm53_vm0, %v44_v0  ;;  %v42_v2 = vld [vmem:[%s307_s1 + $0x8] sm:$0xff]  ;;  %v41_v3 = vld [vmem:[%s307_s1] sm:$0xff]  ;;  %vm49_vm1 = vcmask 228352   ;;  %v121_v22 = vld [vmem:[%s311_s5 + $0x18] sm:$0xf]  ;;  %vm170_vm8 = vcmask 15360  }
   0x6   :  { %v40_v4 = vld [vmem:[#allocation2] sm:$0xff]  ;;  %179 = vmatpush.msk.msra.mxu1 %vm53_vm0, %v121_v22  ;;  %v120_v24 = vld [vmem:[%s311_s5 + $0x10] sm:$0xff]  ;;  %v119_v25 = vld [vmem:[%s311_s5 + $0x8] sm:$0xff] }
   0x7   :  { %70 = vmatpush.msra.mxu0 %v43_v1  ;;  %v182_v5 = vld [vmem:[%s308_s2] ss:$0 sm:$0xff] }
   0x8   :  { %145 = vmatpush.msra.mxu1 %v120_v24  ;;  %v118_v27 = vld [vmem:[%s311_s5] sm:$0xff] }
   0x9   :  { %71 = vmatpush.msra.mxu0 %v42_v2  ;;  %v95_v36 = vld [vmem:[%s309_s3] sm:$0x1] }
   0xa   :  { %146 = vmatpush.msra.mxu1 %v119_v25  ;;  %v183_v41 = vld [vmem:[%s310_s4] ss:$0 sm:$0xff] }
   0xb   :  { %72 = vmatpush.msra.mxu0 %v41_v3  ;;  %v184_v45 = vld [vmem:[%s312_s6] ss:$0 sm:$0xff] }
   0xc   :  { %178 = vmatmul.msk.f32.vlgmr.msra.gmra.mxu0 %vm49_vm1, %v40_v4  ;;  %147 = vmatpush.msra.mxu1 %v118_v27 }
  0x89   :  { %v74_v6 = vpop.f32.mrf.mxu0 }
  0x8a   :  { %v75_v7 = vadd.f32 %v182_v5, %v74_v6 }
  0x8c   :  { %v77_v8 = vsel %vm49_vm1, %v75_v7, 0.0 }
  0x8d   :  { %v78_v9 = vrot.slane %v77_v8, 4 }
  0x8f   :  { %v79_v10 = vadd.f32 %v78_v9, %v77_v8 }
  0x91   :  { %v80_v11 = vrot.slane %v79_v10, 2 }
  0x93   :  { %v81_v12 = vadd.f32 %v80_v11, %v79_v10 }
  0x95   :  { %v82_v13 = vrot.slane %v81_v12, 1 }
  0x97   :  { %v83_v14 = vadd.f32 %v82_v13, %v81_v12 }
  0x99   :  { %v84_v15 = vmul.f32 0.125, %v83_v14 }
  0x9b   :  { %v85_v16 = vsub.f32 %v75_v7, %v84_v15 }
  0x9d   :  { %v86_v17 = vmul.f32 %v85_v16, %v85_v16 }
  0x9f   :  { %v87_v18 = vsel %vm49_vm1, %v86_v17, 0.0 }
  0xa0   :  { %v88_v19 = vrot.slane %v87_v18, 4 }
  0xa2   :  { %v89_v20 = vadd.f32 %v88_v19, %v87_v18 }
  0xa4   :  { %v90_v21 = vrot.slane %v89_v20, 2 }
  0xa6   :  { %v91_v23 = vadd.f32 %v90_v21, %v89_v20 }
  0xa8   :  { %v92_v26 = vrot.slane %v91_v23, 1 }
  0xaa   :  { %v93_v28 = vadd.f32 %v92_v26, %v91_v23 }
  0xac   :  { %v94_v29 = vmul.f32 0.125, %v93_v28 }
  0xae   :  { %v96_v30 = vadd.f32 1e-05, %v94_v29 }
  0xb0   :  { %185 = vrsqrt.f32 %v96_v30  ;;  %vm103_vm3 = vweird.f32 %v96_v30 }
  0xb6   :  { %v186_v31 = vpop.eup %185 }
  0xb7   :  { %v98_v32 = vmul.f32 %v186_v31, %v96_v30  ;;  %vm104_vm2 = vweird.f32 %v186_v31 }
  0xb8   :  { %vm105_vm4 = vmor %vm103_vm3, %vm104_vm2 }
  0xb9   :  { %v99_v33 = vmul.f32 %v186_v31, %v98_v32 }
  0xbb   :  { %v100_v34 = vmul.f32 0.5, %v99_v33 }
  0xbd   :  { %v101_v35 = vsub.f32 1.5, %v100_v34 }
  0xbf   :  { %v102_v37 = vmul.f32 %v186_v31, %v101_v35 }
  0xc1   :  { %v106_v38 = vsel %vm105_vm4, %v186_v31, %v102_v37 }
  0xc2   :  { %v107_v39 = vmul.f32 %v106_v38, %v95_v36 }
  0xc4   :  { %v109_v40 = vperm.slane %v107_v39, 0 }
  0xc6   :  { %v111_v42 = vmul.f32 %v109_v40, %v85_v16 }
  0xc8   :  { %v116_v43 = vadd.f32 %v183_v41, %v111_v42 }
  0xca   :  { %v117_v44 = vmax.f32 %v116_v43, 0.0 }
  0xcc   :  { %180 = vmatmul.msk.f32.vlgmr.msra.gmra.mxu1 %vm49_vm1, %v117_v44 }
 0x149   :  { %v149_v46 = vpop.f32.mrf.mxu1 }
 0x14a   :  { %v150_v47 = vadd.f32 %v184_v45, %v149_v46 }
 0x14c   :  { %v152_v48 = vsub.f32 0.0, %v150_v47 }
 0x14e   :  { %v153_v49 = vmul.f32 1.442695, %v152_v48 }
 0x150   :  { %187 = vpow2.f32 %v153_v49 }
 0x156   :  { %v188_v50 = vpop.eup %187 }
 0x157   :  { %v155_v51 = vadd.f32 1.0, %v188_v50 }
 0x159   :  { %189 = vrcp.f32 %v155_v51  ;;  %v167_v55 = vand.u32 2147483648, %v155_v51  ;;  %v165_v57 = vand.u32 2147483647, %v155_v51  ;;  %vm161_vm6 = vweird.f32 %v155_v51 }
 0x15b   :  { %v168_v59 = vor.u32 1.1754944e-38, %v167_v55  ;;  %vm166_vm9 = vcmp.eq.f32.partialorder %v165_v57, 8.507059e+37 }
 0x15f   :  { %v190_v52 = vpop.eup %189 }
 0x160   :  { %v157_v53 = vmul.f32 %v190_v52, %v155_v51  ;;  %vm162_vm5 = vweird.f32 %v190_v52 }
 0x161   :  { %vm163_vm7 = vmor %vm161_vm6, %vm162_vm5 }
 0x162   :  { %v158_v54 = vsub.f32 1.0, %v157_v53 }
 0x164   :  { %v159_v56 = vmul.f32 %v190_v52, %v158_v54 }
 0x166   :  { %v160_v58 = vadd.f32 %v190_v52, %v159_v56 }
 0x168   :  { %v164_v60 = vsel %vm163_vm7, %v190_v52, %v160_v58 }
 0x169   :  { %v169_v61 = vsel %vm166_vm9, %v168_v59, %v164_v60 }
 0x16a   :  { %171 = vst.msk [vmem:[%s313_s7] sm:$0xff] %vm170_vm8, %v169_v61 }
 0x16b   :  { %176 = vsyncpa [#allocation3], 1 }

</bundles_post_ra>
